<compile_context>
chip_gen: v7x
topology: tpu7x:2x2x1
jax: 0.10.0
libtpu: 0.0.40
codegen_flags: <defaults>
</compile_context>

<pallas_src>
import math

import jax
import jax.numpy as jnp
from jax.experimental import pallas as pl
from jax.experimental.pallas import tpu as pltpu

LANE = 128
SUBLANE = 8
_VMEM_BUDGET = 20 * 1024 * 1024   # conservative per-kernel tile budget


def _round_up(x, m):
    return (x + m - 1) // m * m


def _mosaic_params(semantics, vmem_estimate_bytes):
    kwargs = dict(dimension_semantics=semantics)
    if vmem_estimate_bytes > 12 * 1024 * 1024:
        # Raise the scoped VMEM limit only when the footprint needs it
        # (v5e default is 16 MiB); cap at v7x's 64 MiB physical per-TC.
        kwargs["vmem_limit_bytes"] = int(
            min(max(2 * vmem_estimate_bytes, 32 << 20), 64 << 20))
    return pltpu.CompilerParams(**kwargs)


# ---------------------------------------------------------------------------
# Projection pass: out = x @ w + bias
#   Rows tiled ('parallel'); weight kept resident, or column-tiled when the
#   weight slab is large (v7x VMEM).
# ---------------------------------------------------------------------------
def _projection_kernel(x_ref, w_ref, b_ref, o_ref):
    o_ref[...] = (jnp.dot(x_ref[...], w_ref[...],
                          preferred_element_type=jnp.float32)
                  + b_ref[...]).astype(o_ref.dtype)


def _projection(x2d, w, bias_row, out_dtype):
    """x2d: (M, K), w: (K, Fp) with Fp % 128 == 0, bias_row: (1, Fp) float32."""
    M, K = x2d.shape
    Fp = w.shape[1]

    # Row tiling: biggest tile <= 512 with >= 2 steps when possible so both
    # TensorCores of a v7x chip get work on the 'parallel' row axis.
    if M <= 256:
        tm = M
    elif M <= 1024:
        tm = _round_up(M // 2, SUBLANE)
    else:
        tm = 512
    Mp = _round_up(M, tm)
    if Mp != M:
        x2d = jnp.pad(x2d, ((0, Mp - M), (0, 0)))

    # Column tiling only when the resident weight slab would stress VMEM.
    if Fp <= 512:
        tn = Fp
    else:
        tn = 512 if Fp % 512 == 0 else (256 if Fp % 256 == 0 else LANE)
    # TODO(synk): for very large Fin (K) also tile K with an f32 accumulator;
    # here K stays resident and vmem_limit_bytes is raised instead.

    xb = x2d.dtype.itemsize
    wb = w.dtype.itemsize
    ob = jnp.dtype(out_dtype).itemsize
    est = 2 * tm * K * xb + 2 * K * tn * wb + 2 * tm * tn * ob + 2 * tn * 4

    if tn == Fp:
        grid = (Mp // tm,)
        in_specs = [pl.BlockSpec((tm, K), lambda i: (i, 0)),
                    pl.BlockSpec((K, Fp), lambda i: (0, 0)),
                    pl.BlockSpec((1, Fp), lambda i: (0, 0))]
        out_specs = pl.BlockSpec((tm, Fp), lambda i: (i, 0))
        semantics = ("parallel",)
    else:
        grid = (Mp // tm, Fp // tn)
        in_specs = [pl.BlockSpec((tm, K), lambda i, j: (i, 0)),
                    pl.BlockSpec((K, tn), lambda i, j: (0, j)),
                    pl.BlockSpec((1, tn), lambda i, j: (0, j))]
        out_specs = pl.BlockSpec((tm, tn), lambda i, j: (i, j))
        semantics = ("parallel", "parallel")

    out = pl.pallas_call(
        _projection_kernel,
        out_shape=jax.ShapeDtypeStruct((Mp, Fp), out_dtype),
        grid_spec=pltpu.PrefetchScalarGridSpec(
            num_scalar_prefetch=0, grid=grid,
            in_specs=in_specs, out_specs=out_specs),
        compiler_params=_mosaic_params(semantics, est),
        cost_estimate=pl.CostEstimate(
            flops=2 * Mp * K * Fp, transcendentals=0,
            bytes_accessed=xb * Mp * K + wb * K * Fp + ob * Mp * Fp),
    )(x2d, w, bias_row)
    return out[:M]


# ---------------------------------------------------------------------------
# Aggregation pass: out = (adj @ hid) / (rowsum(adj) + 1) + bias
#   grid = (batch, row-tiles, k-tiles); reduction axis (k) last, fused row-sum.
# ---------------------------------------------------------------------------
def _agg_vmem_bytes(tm, tk, Np, Fp, adj_b, hid_b, out_b, hid_resident, acc_in_out):
    total = 2 * tm * tk * adj_b                                  # adj (double-buffered)
    total += (2 * Np if hid_resident else 2 * tk) * Fp * hid_b   # hidden
    total += 2 * tm * Fp * out_b                                 # output
    if not acc_in_out:
        total += tm * Fp * 4                                     # f32 acc scratch
    total += tm * LANE * 4 + 2 * Fp * 4                          # denom scratch + bias
    return total


def _make_aggregate_kernel(tk, hid_resident, acc_in_out):
    def kernel(adj_ref, hid_ref, b_ref, o_ref, *scratch):
        if acc_in_out:                 # f32 output block doubles as accumulator
            (den_ref,) = scratch
            acc_ref = o_ref
        else:
            acc_ref, den_ref = scratch

        k = pl.program_id(2)

        @pl.when(k == 0)
        def _():
            acc_ref[...] = jnp.zeros_like(acc_ref)
            den_ref[...] = jnp.ones_like(den_ref)     # folds the "+1" of denom

        adj_t = adj_ref[...]
        if hid_resident:
            hid_t = hid_ref[pl.ds(pl.multiple_of(k * tk, tk), tk), :]
        else:
            hid_t = hid_ref[...]

        acc_ref[...] += jnp.dot(adj_t, hid_t, preferred_element_type=jnp.float32)
        # Row-sum fused into the same pass over adj (padded columns are zero).
        den_ref[...] += jnp.sum(adj_t.astype(jnp.float32), axis=1, keepdims=True)

        @pl.when(k == pl.num_programs(2) - 1)
        def _():
            # Exact reciprocal keeps 1e-5 parity with the f32 reference.
            inv = pl.reciprocal(den_ref[...], approx=False)
            o_ref[...] = (acc_ref[...] * inv + b_ref[...]).astype(o_ref.dtype)

    return kernel


def _aggregate(adj_p, hid_p, bias_row, out_dtype, tm, tk):
    """adj_p: (B, Np, Np), hid_p: (B, Np, Fp), bias_row: (1, Fp) float32."""
    B, Np, _ = adj_p.shape
    Fp = hid_p.shape[-1]
    adj_b = adj_p.dtype.itemsize
    hid_b = hid_p.dtype.itemsize
    out_b = jnp.dtype(out_dtype).itemsize

    acc_in_out = jnp.dtype(out_dtype) == jnp.dtype(jnp.float32)
    n_k = Np // tk

    # Keep the per-batch hidden slab VMEM-resident when it is cheap: removes
    # the (Np / tm)-fold HBM re-read of hidden across row tiles.
    res_bytes = _agg_vmem_bytes(tm, tk, Np, Fp, adj_b, hid_b, out_b, True, acc_in_out)
    hid_resident = (n_k > 1) and (res_bytes <= _VMEM_BUDGET)
    est = res_bytes if hid_resident else _agg_vmem_bytes(
        tm, tk, Np, Fp, adj_b, hid_b, out_b, False, acc_in_out)

    kernel = _make_aggregate_kernel(tk, hid_resident, acc_in_out)

    if hid_resident:
        hid_spec = pl.BlockSpec((pl.Squeezed(), Np, Fp), lambda b, i, k: (b, 0, 0))
    else:
        hid_spec = pl.BlockSpec((pl.Squeezed(), tk, Fp), lambda b, i, k: (b, k, 0))

    scratch = [pltpu.VMEM((tm, 1), jnp.float32)]       # denominator rows
    if not acc_in_out:
        scratch.insert(0, pltpu.VMEM((tm, Fp), jnp.float32))

    # TODO(synk): if profiling shows exposed adj DMA at small Fp, deepen the adj
    # pipeline with pipeline_mode=pl.Buffered(3) on the adj BlockSpec.
    hid_reads = 1 if hid_resident else Np // tm
    out = pl.pallas_call(
        kernel,
        out_shape=jax.ShapeDtypeStruct((B, Np, Fp), out_dtype),
        grid_spec=pltpu.PrefetchScalarGridSpec(
            num_scalar_prefetch=0,
            grid=(B, Np // tm, n_k),
            in_specs=[
                pl.BlockSpec((pl.Squeezed(), tm, tk), lambda b, i, k: (b, i, k)),
                hid_spec,
                pl.BlockSpec((1, Fp), lambda b, i, k: (0, 0)),
            ],
            out_specs=pl.BlockSpec((pl.Squeezed(), tm, Fp), lambda b, i, k: (b, i, 0)),
            scratch_shapes=scratch,
        ),
        compiler_params=_mosaic_params(("parallel", "parallel", "arbitrary"), est),
        cost_estimate=pl.CostEstimate(
            flops=2 * B * Np * Np * Fp + B * Np * Np,
            transcendentals=0,
            bytes_accessed=(adj_b * B * Np * Np
                            + hid_b * B * Np * Fp * hid_reads
                            + out_b * B * Np * Fp + 4 * Fp)),
    )(adj_p, hid_p, bias_row)
    return out


# ---------------------------------------------------------------------------
# Top-level GCN layer forward
# ---------------------------------------------------------------------------
def graph_convolution(text, adj, weight, bias=None, *, precision="float32"):
    """text: (B, N, Fin), adj: (B, N, N), weight: (Fin, Fout), bias: (Fout,)|None.

    precision="float32" keeps 1e-5 parity with the torch reference;
    precision="bfloat16" uses bf16 GEMM inputs / bf16 intermediate (f32 accum).
    """
    B, N, Fin = text.shape
    Fout = weight.shape[1]
    out_dtype = text.dtype
    use_bf16 = (precision == "bfloat16")
    gemm_dtype = jnp.bfloat16 if use_bf16 else out_dtype

    if bias is None:
        bias = jnp.zeros((Fout,), dtype=jnp.float32)

    Fout_p = _round_up(Fout, LANE)
    Fin_p = _round_up(Fin, LANE)

    # Matmul association: make the O(B*N^2) aggregation GEMM's inner width
    # min(Fin_p, Fout_p) and shrink the intermediate's HBM round-trip.
    aggregate_first = Fin_p < Fout_p
    F_lane = Fin_p if aggregate_first else Fout_p     # aggregation lane width

    # ---- N padding / adj tile choice (lane-dense, VMEM-budgeted) -----------
    adj_b = 2 if use_bf16 else jnp.dtype(out_dtype).itemsize
    hid_b = 2 if use_bf16 else jnp.dtype(out_dtype).itemsize
    out_b = jnp.dtype(out_dtype).itemsize
    if N <= 512:
        tile = _round_up(N, LANE)                     # single lane-dense block
        Np = tile
    else:
        Np256, Np512 = _round_up(N, 256), _round_up(N, 512)
        fits512 = _agg_vmem_bytes(512, 512, Np512, F_lane,
                                  adj_b, hid_b, out_b, False, False) <= _VMEM_BUDGET
        if fits512 and (Np512 - Np256) <= 128:        # don't blow up adj padding
            tile, Np = 512, Np512
        else:
            tile, Np = 256, Np256
    tm = tk = tile

    adj_p = adj if Np == N else jnp.pad(adj, ((0, 0), (0, Np - N), (0, Np - N)))
    bias_row = jnp.pad(bias.astype(jnp.float32),
                       ((0, Fout_p - Fout),)).reshape(1, Fout_p)

    if aggregate_first:
        # tmp = (adj @ text) / denom, then out = tmp @ W + bias
        text_p = jnp.pad(text, ((0, 0), (0, Np - N), (0, Fin_p - Fin)))
        zero_row = jnp.zeros((1, Fin_p), jnp.float32)
        tmp = _aggregate(adj_p.astype(gemm_dtype), text_p.astype(gemm_dtype),
                         zero_row, gemm_dtype, tm, tk)          # (B, Np, Fin_p)
        w_p = jnp.pad(weight, ((0, Fin_p - Fin), (0, Fout_p - Fout)))
        out_flat = _projection(tmp.reshape(B * Np, Fin_p),
                               w_p.astype(gemm_dtype), bias_row, out_dtype)
        out_p = out_flat.reshape(B, Np, Fout_p)
    else:
        # hidden = text @ W, then out = (adj @ hidden) / denom + bias
        text_p = text if Np == N else jnp.pad(text, ((0, 0), (0, Np - N), (0, 0)))
        w_p = jnp.pad(weight, ((0, 0), (0, Fout_p - Fout)))
        zero_row = jnp.zeros((1, Fout_p), jnp.float32)
        hidden_flat = _projection(text_p.reshape(B * Np, Fin).astype(gemm_dtype),
                                  w_p.astype(gemm_dtype), zero_row, gemm_dtype)
        hidden = hidden_flat.reshape(B, Np, Fout_p)
        out_p = _aggregate(adj_p.astype(gemm_dtype), hidden, bias_row,
                           out_dtype, tm, tk)

    return out_p[:, :N, :Fout]


def reference(text, adj, weight, bias):
    hidden = jnp.matmul(text, weight)
    denom = jnp.sum(adj, axis=2, keepdims=True) + 1.0
    out = jnp.matmul(adj, hidden) / denom
    return (out + bias) if bias is not None else out


if __name__ == "__main__":
    def make_inputs(key, B, N, Fin, Fout):
        k_text, k_adj, k_w, k_b = jax.random.split(key, 4)
        text = jax.random.normal(k_text, (B, N, Fin), dtype=jnp.float32)
        # Nonnegative adjacency (typical normalized adj); keeps denom > 0.
        adj = jax.random.uniform(k_adj, (B, N, N), dtype=jnp.float32)
        # reset_parameters(): uniform(-stdv, stdv) with stdv = 1/sqrt(out_features)
        stdv = 1.0 / math.sqrt(Fout)
        weight = jax.random.uniform(k_w, (Fin, Fout), jnp.float32, -stdv, stdv)
        bias = jax.random.uniform(k_b, (Fout,), jnp.float32, -stdv, stdv)
        return text, adj, weight, bias

    cases = [
        # (name, B, N, Fin, Fout, f32_tol)
        ("project_first_small", 2, 16, 32, 16, 1e-5),
        ("aggregate_first_small", 2, 16, 16, 160, 1e-5),
        ("tiled_medium", 2, 520, 32, 48, 1e-4),   # exercises k-tiling + resident hidden
    ]
    keys = jax.random.split(jax.random.PRNGKey(0), len(cases))
    for (name, B, N, Fin, Fout, tol), k in zip(cases, keys):
        text, adj, weight, bias = make_inputs(k, B, N, Fin, Fout)
        ref = reference(text, adj, weight, bias)

        out = jax.block_until_ready(graph_convolution(text, adj, weight, bias))
        assert out.shape == (B, N, Fout), name
        assert jnp.allclose(out, ref, atol=tol, rtol=tol), f"f32 mismatch: {name}"

        # bf16 fast path (gated): loose tolerance vs. the f32 reference.
        out_bf = jax.block_until_ready(
            graph_convolution(text, adj, weight, bias, precision="bfloat16"))
        assert out_bf.shape == (B, N, Fout), name
        assert jnp.allclose(out_bf, ref, atol=5e-2, rtol=5e-2), f"bf16 mismatch: {name}"

    # bias=None path
    text, adj, weight, _ = make_inputs(keys[0], 2, 16, 32, 16)
    out_nb = jax.block_until_ready(graph_convolution(text, adj, weight, None))
    ref_nb = reference(text, adj, weight, None)
    assert jnp.allclose(out_nb, ref_nb, atol=1e-5, rtol=1e-5), "bias=None mismatch"

    print("KERNEL_OK")
</pallas_src>

<mosaic_0001>
module attributes {stable_mosaic.version = 11 : i64} {
  func.func @_projection_kernel(%arg0: i32, %arg1: memref<256x32xf32, #tpu.memory_space<vmem>>, %arg2: memref<32x128xf32, #tpu.memory_space<vmem>>, %arg3: memref<1x128xf32, #tpu.memory_space<vmem>>, %arg4: memref<256x128xf32, #tpu.memory_space<vmem>>) attributes {dimension_semantics = [#tpu.dimension_semantics<parallel>], iteration_bounds = array<i64: 1>, scalar_prefetch = 0 : i64, scratch_operands = 0 : i64, tpu.core_type = #tpu.core_type<tc>, window_params = [{transform_indices = @transform_0, window_bounds = array<i64: 256, 32>}, {pipeline_mode = #tpu.pipeline_mode<synchronous>, transform_indices = @transform_1, window_bounds = array<i64: 32, 128>}, {pipeline_mode = #tpu.pipeline_mode<synchronous>, transform_indices = @transform_2, window_bounds = array<i64: 1, 128>}, {transform_indices = @transform_3, window_bounds = array<i64: 256, 128>}]} {
    %c0 = arith.constant 0 : index
    %c0_0 = arith.constant 0 : index
    %0 = vector.load %arg1[%c0, %c0_0] : memref<256x32xf32, #tpu.memory_space<vmem>>, vector<256x32xf32>
    %c0_1 = arith.constant 0 : index
    %c0_2 = arith.constant 0 : index
    %1 = vector.load %arg2[%c0_1, %c0_2] : memref<32x128xf32, #tpu.memory_space<vmem>>, vector<32x128xf32>
    %cst = arith.constant dense<0.000000e+00> : vector<256x128xf32>
    %2 = tpu.matmul %0, %1, %cst {dimension_numbers = #tpu.dot_dimension_numbers<[1], [0], [0], [1], [0, 0, 1, 1], [], []>} : vector<256x32xf32>, vector<32x128xf32>, vector<256x128xf32> -> vector<256x128xf32>
    %c0_3 = arith.constant 0 : index
    %c0_4 = arith.constant 0 : index
    %3 = vector.load %arg3[%c0_3, %c0_4] : memref<1x128xf32, #tpu.memory_space<vmem>>, vector<1x128xf32>
    %4 = vector.broadcast %3 : vector<1x128xf32> to vector<256x128xf32>
    %5 = arith.addf %2, %4 : vector<256x128xf32>
    %c0_5 = arith.constant 0 : index
    %c0_6 = arith.constant 0 : index
    %6 = vector.load %arg4[%c0_5, %c0_6] : memref<256x128xf32, #tpu.memory_space<vmem>>, vector<256x128xf32>
    tpu.vector_store %arg4[%c0_5, %c0_6], %5 {strides = array<i32>} : memref<256x128xf32, #tpu.memory_space<vmem>>, vector<256x128xf32>,
    return
  }
  func.func @transform_0(%arg0: i32) -> (i32, i32) {
    %c0_i32 = arith.constant 0 : i32
    %c0_i32_0 = arith.constant 0 : i32
    return %arg0, %c0_i32 : i32, i32
  }
  func.func @transform_1(%arg0: i32) -> (i32, i32) {
    %c0_i32 = arith.constant 0 : i32
    %c0_i32_0 = arith.constant 0 : i32
    %c0_i32_1 = arith.constant 0 : i32
    return %c0_i32, %c0_i32_0 : i32, i32
  }
  func.func @transform_2(%arg0: i32) -> (i32, i32) {
    %c0_i32 = arith.constant 0 : i32
    %c0_i32_0 = arith.constant 0 : i32
    %c0_i32_1 = arith.constant 0 : i32
    return %c0_i32, %c0_i32_0 : i32, i32
  }
  func.func @transform_3(%arg0: i32) -> (i32, i32) {
    %c0_i32 = arith.constant 0 : i32
    %c0_i32_0 = arith.constant 0 : i32
    return %arg0, %c0_i32 : i32, i32
  }
}

</mosaic_0001>

<bundles_post_ra>
// kernel: tpu_custom_call.1
= control target key start
LH: loop header
LB: loop body
LE: loop exit
PB: predicated region body
PF: predicated region fallthrough
CT: control target
= control target key end

     0   :  { %vm58_vm0 = vcmask 261120   ;;  %s804_s0 = inlined_call_operand.vmem [shape: f32[256,32], index: 0, kind: input, shape index: {}]   ;;  %s805_s1 = inlined_call_operand.vmem [shape: f32[32,128], index: 1, kind: input, shape index: {}]   ;;  %s806_s2 = inlined_call_operand.vmem [shape: f32[1,128], index: 2, kind: input, shape index: {}]   ;;  %s807_s3 = inlined_call_operand.hbm [shape: f32[256,128], index: 3, kind: output, shape index: {}]  }
   0x1   :  { %v47_v0 = vld [vmem:[%s805_s1] sm:$0xff]  ;;  %v48_v1 = vld [vmem:[%s805_s1 + $0x8] sm:$0xff]  ;;  %v49_v2 = vld [vmem:[%s805_s1 + $0x10] sm:$0xff] }
   0x2   :  { %v553_v3 = vpack.c.bf16 %v48_v1, %v47_v0  ;;  %v50_v4 = vld [vmem:[%s805_s1 + $0x18] sm:$0xff]  ;;  %v15_v5 = vld [vmem:[%s804_s0] sm:$0xff]  ;;  %v16_v8 = vld [vmem:[%s804_s0 + $0x8] sm:$0xff] }
   0x3   :  { %v31_v6 = vld [vmem:[%s804_s0 + $0x80] sm:$0xff]  ;;  %v557_v7 = vpack.c.bf16 %v50_v4, %v49_v2  ;;  %505 = vmatprep.mubr.msk.f32.mxu0 %vm58_vm0, %v15_v5  ;;  %v32_v9 = vld [vmem:[%s804_s0 + $0x88] sm:$0xff]  ;;  %v17_v10 = vld [vmem:[%s804_s0 + $0x10] sm:$0xff] }
   0x4   :  { %529 = vmatprep.mubr.msk.f32.mxu1 %vm58_vm0, %v31_v6  ;;  %554 = vmatprep.subr.bf16.mxu0 %v553_v3  ;;  %v33_v11 = vld [vmem:[%s804_s0 + $0x90] sm:$0xff]  ;;  %v18_v12 = vld [vmem:[%s804_s0 + $0x18] sm:$0xff] }
   0x5   :  { %561 = vmatprep.subr.bf16.mxu1 %v553_v3  ;;  %556 = vmatpush3.bf16.msra.mxu0 %v553_v3  ;;  %v34_v13 = vld [vmem:[%s804_s0 + $0x98] sm:$0xff] }
   0x6   :  { %563 = vmatpush3.bf16.msra.mxu1 %v553_v3  ;;  %558 = vmatprep.subr.bf16.mxu0 %v557_v7 }
   0x7   :  { %562 = vmatprep.subr.bf16.mxu1 %v557_v7 }
   0x9   :  { %560 = vmatpush3.bf16.msra.mxu0 %v557_v7 }
   0xa   :  { %564 = vmatpush3.bf16.msra.mxu1 %v557_v7 }
   0xc   :  { %506 = vmatmul.mubr.msk.f32.vlgmr.msra.gmra.mrb[0].mxu0 %vm58_vm0, %v16_v8 }
   0xd   :  { %530 = vmatmul.mubr.msk.f32.vlgmr.msra.gmra.mrb[0].mxu1 %vm58_vm0, %v32_v9  ;;  %508 = vmatprep.mubr.msk.f32.mxu0 %vm58_vm0, %v17_v10 }
   0xe   :  { %532 = vmatprep.mubr.msk.f32.mxu1 %vm58_vm0, %v33_v11 }
   0xf   :  { %8 = vsyncpa [#allocation3], 0  ;;  %v19_v14 = vld [vmem:[%s804_s0 + $0x20] sm:$0xff]  ;;  %v20_v16 = vld [vmem:[%s804_s0 + $0x28] sm:$0xff] }
  0x10   :  { %v35_v15 = vld [vmem:[%s804_s0 + $0xa0] sm:$0xff]  ;;  %509 = vmatmul.mubr.msk.f32.gmra.mrb[2].mxu0 %vm58_vm0, %v18_v12  ;;  %v36_v17 = vld [vmem:[%s804_s0 + $0xa8] sm:$0xff]  ;;  %v21_v18 = vld [vmem:[%s804_s0 + $0x30] sm:$0xff] }
  0x11   :  { %533 = vmatmul.mubr.msk.f32.gmra.mrb[2].mxu1 %vm58_vm0, %v34_v13  ;;  %511 = vmatprep.mubr.msk.f32.mxu0 %vm58_vm0, %v19_v14  ;;  %v37_v19 = vld [vmem:[%s804_s0 + $0xb0] sm:$0xff]  ;;  %v22_v20 = vld [vmem:[%s804_s0 + $0x38] sm:$0xff]  ;;  %v23_v22 = vld [vmem:[%s804_s0 + $0x40] sm:$0xff] }
  0x12   :  { %535 = vmatprep.mubr.msk.f32.mxu1 %vm58_vm0, %v35_v15  ;;  %v38_v21 = vld [vmem:[%s804_s0 + $0xb8] sm:$0xff]  ;;  %v39_v23 = vld [vmem:[%s804_s0 + $0xc0] sm:$0xff]  ;;  %v24_v24 = vld [vmem:[%s804_s0 + $0x48] sm:$0xff] }
  0x13   :  { %v40_v25 = vld [vmem:[%s804_s0 + $0xc8] sm:$0xff]  ;;  %v25_v26 = vld [vmem:[%s804_s0 + $0x50] sm:$0xff]  ;;  %v26_v28 = vld [vmem:[%s804_s0 + $0x58] sm:$0xff] }
  0x14   :  { %512 = vmatmul.mubr.msk.f32.gmra.mrb[4].mxu0 %vm58_vm0, %v20_v16  ;;  %v41_v27 = vld [vmem:[%s804_s0 + $0xd0] sm:$0xff]  ;;  %v42_v29 = vld [vmem:[%s804_s0 + $0xd8] sm:$0xff]  ;;  %v27_v30 = vld [vmem:[%s804_s0 + $0x60] sm:$0xff] }
  0x15   :  { %536 = vmatmul.mubr.msk.f32.gmra.mrb[4].mxu1 %vm58_vm0, %v36_v17  ;;  %514 = vmatprep.mubr.msk.f32.mxu0 %vm58_vm0, %v21_v18  ;;  %v43_v31 = vld [vmem:[%s804_s0 + $0xe0] sm:$0xff]  ;;  %v28_v32 = vld [vmem:[%s804_s0 + $0x68] sm:$0xff]  ;;  %v29_v34 = vld [vmem:[%s804_s0 + $0x70] sm:$0xff] }
  0x16   :  { %538 = vmatprep.mubr.msk.f32.mxu1 %vm58_vm0, %v37_v19  ;;  %v44_v33 = vld [vmem:[%s804_s0 + $0xe8] sm:$0xff]  ;;  %v45_v35 = vld [vmem:[%s804_s0 + $0xf0] sm:$0xff]  ;;  %v30_v36 = vld [vmem:[%s804_s0 + $0x78] sm:$0xff] }
  0x17   :  { %v46_v37 = vld [vmem:[%s804_s0 + $0xf8] sm:$0xff]  ;;  %v758_v38 = vld [vmem:[%s806_s2] ss:$0 sm:$0xff]  ;;  %s592_s0 = smov [#allocation2]  }
  0x18   :  { %515 = vmatmul.mubr.msk.f32.gmra.mrb[6].mxu0 %vm58_vm0, %v22_v20  ;;  %s417_s2 = sshll.u32 %s592_s0, 4  ;;  %s418_s2 = int_to_ptr.vmem [resolvable:$true] %s417_s2 }
  0x19   :  { %539 = vmatmul.mubr.msk.f32.gmra.mrb[6].mxu1 %vm58_vm0, %v38_v21  ;;  %517 = vmatprep.mubr.msk.f32.mxu0 %vm58_vm0, %v23_v22  ;;  %s568_s29 = scalar_lea.vmem %s418_s2, 4096  ;;  %p573_p1 = scmp.lt.s32.totalorder %s418_s2, %s418_s2 }
  0x1a   :  { %541 = vmatprep.mubr.msk.f32.mxu1 %vm58_vm0, %v39_v23  ;;  %p569_p0 = scmp.ne.s32.totalorder %s418_s2, %s568_s29  ;;  %p574_p2 = scmp.lt.s32.totalorder %s568_s29, %s568_s29 }
  0x1c   :  { %518 = vmatmul.mubr.msk.f32.gmra.mrb[8].mxu0 %vm58_vm0, %v24_v24  ;;  %p575_p3 = por %p574_p2, %p573_p1 }
  0x1d   :  { %542 = vmatmul.mubr.msk.f32.gmra.mrb[8].mxu1 %vm58_vm0, %v40_v25  ;;  %520 = vmatprep.mubr.msk.f32.mxu0 %vm58_vm0, %v25_v26 }
  0x1e   :  { %544 = vmatprep.mubr.msk.f32.mxu1 %vm58_vm0, %v41_v27  ;;  %p576_p4 = pnand %p575_p3, %p569_p0 }
  0x20   :  { %521 = vmatmul.mubr.msk.f32.gmra.mrb[10].mxu0 %vm58_vm0, %v26_v28 }
  0x21   :  { %545 = vmatmul.mubr.msk.f32.gmra.mrb[10].mxu1 %vm58_vm0, %v42_v29  ;;  %523 = vmatprep.mubr.msk.f32.mxu0 %vm58_vm0, %v27_v30 }
  0x22   :  { %547 = vmatprep.mubr.msk.f32.mxu1 %vm58_vm0, %v43_v31 }
  0x24   :  { %524 = vmatmul.mubr.msk.f32.gmra.mrb[12].mxu0 %vm58_vm0, %v28_v32 }
  0x25   :  { %548 = vmatmul.mubr.msk.f32.gmra.mrb[12].mxu1 %vm58_vm0, %v44_v33  ;;  %526 = vmatprep.mubr.msk.f32.mxu0 %vm58_vm0, %v29_v34 }
  0x26   :  { %550 = vmatprep.mubr.msk.f32.mxu1 %vm58_vm0, %v45_v35 }
  0x28   :  { %527 = vmatmul.mubr.msk.f32.gmra.mrb[14].mxu0 %vm58_vm0, %v30_v36 }
  0x29   :  { %551 = vmatmul.mubr.msk.f32.gmra.mrb[14].mxu1 %vm58_vm0, %v46_v37 }
  0xdf   :  { %v507_v39 = vpop.f32.mrb[0].mxu0 }
  0xe0   :  { %v531_v40 = vpop.f32.mrb[0].mxu1  ;;  %v227_v41 = vadd.f32 %v507_v39, %v758_v38  ;;  %v221_v43 = vpop.f32.mrb[1].mxu0 }
  0xe1   :  { %v307_v42 = vadd.f32 %v531_v40, %v758_v38  ;;  %v301_v44 = vpop.f32.mrb[1].mxu1  ;;  %v222_v45 = vadd.f32 %v758_v38, %v221_v43 }
  0xe2   :  { %v302_v46 = vadd.f32 %v758_v38, %v301_v44  ;;  %381 = vst [vmem:[#allocation2 + $0x8] sm:$0xff] %v227_v41 }
  0xe3   :  { %397 = vst [vmem:[#allocation2 + $0x88] sm:$0xff] %v307_v42  ;;  %380 = vst [vmem:[#allocation2] sm:$0xff] %v222_v45  ;;  %v510_v47 = vpop.f32.mrb[2].mxu0 }
  0xe4   :  { %396 = vst [vmem:[#allocation2 + $0x80] sm:$0xff] %v302_v46  ;;  %v534_v48 = vpop.f32.mrb[2].mxu1  ;;  %v237_v49 = vadd.f32 %v510_v47, %v758_v38  ;;  %v231_v51 = vpop.f32.mrb[3].mxu0 }
  0xe5   :  { %v317_v50 = vadd.f32 %v534_v48, %v758_v38  ;;  %v311_v52 = vpop.f32.mrb[3].mxu1  ;;  %v232_v53 = vadd.f32 %v758_v38, %v231_v51 }
  0xe6   :  { %v312_v54 = vadd.f32 %v758_v38, %v311_v52  ;;  %383 = vst [vmem:[#allocation2 + $0x18] sm:$0xff] %v237_v49 }
  0xe7   :  { %399 = vst [vmem:[#allocation2 + $0x98] sm:$0xff] %v317_v50  ;;  %382 = vst [vmem:[#allocation2 + $0x10] sm:$0xff] %v232_v53  ;;  %v513_v55 = vpop.f32.mrb[4].mxu0 }
  0xe8   :  { %398 = vst [vmem:[#allocation2 + $0x90] sm:$0xff] %v312_v54  ;;  %v537_v56 = vpop.f32.mrb[4].mxu1  ;;  %v247_v57 = vadd.f32 %v513_v55, %v758_v38  ;;  %v241_v59 = vpop.f32.mrb[5].mxu0 }
  0xe9   :  { %v327_v58 = vadd.f32 %v537_v56, %v758_v38  ;;  %v321_v60 = vpop.f32.mrb[5].mxu1  ;;  %v242_v61 = vadd.f32 %v758_v38, %v241_v59 }
  0xea   :  { %v322_v62 = vadd.f32 %v758_v38, %v321_v60  ;;  %385 = vst [vmem:[#allocation2 + $0x28] sm:$0xff] %v247_v57 }
  0xeb   :  { %401 = vst [vmem:[#allocation2 + $0xa8] sm:$0xff] %v327_v58  ;;  %384 = vst [vmem:[#allocation2 + $0x20] sm:$0xff] %v242_v61  ;;  %v516_v63 = vpop.f32.mrb[6].mxu0 }
  0xec   :  { %400 = vst [vmem:[#allocation2 + $0xa0] sm:$0xff] %v322_v62  ;;  %v540_v0 = vpop.f32.mrb[6].mxu1  ;;  %v257_v1 = vadd.f32 %v516_v63, %v758_v38  ;;  %v251_v3 = vpop.f32.mrb[7].mxu0 }
  0xed   :  { %v337_v2 = vadd.f32 %v540_v0, %v758_v38  ;;  %v331_v4 = vpop.f32.mrb[7].mxu1  ;;  %v252_v5 = vadd.f32 %v758_v38, %v251_v3 }
  0xee   :  { %v332_v6 = vadd.f32 %v758_v38, %v331_v4  ;;  %387 = vst [vmem:[#allocation2 + $0x38] sm:$0xff] %v257_v1 }
  0xef   :  { %403 = vst [vmem:[#allocation2 + $0xb8] sm:$0xff] %v337_v2  ;;  %386 = vst [vmem:[#allocation2 + $0x30] sm:$0xff] %v252_v5  ;;  %v519_v7 = vpop.f32.mrb[8].mxu0 }
  0xf0   :  { %402 = vst [vmem:[#allocation2 + $0xb0] sm:$0xff] %v332_v6  ;;  %v543_v8 = vpop.f32.mrb[8].mxu1  ;;  %v267_v9 = vadd.f32 %v519_v7, %v758_v38  ;;  %v261_v11 = vpop.f32.mrb[9].mxu0 }
  0xf1   :  { %v347_v10 = vadd.f32 %v543_v8, %v758_v38  ;;  %v341_v12 = vpop.f32.mrb[9].mxu1  ;;  %v262_v13 = vadd.f32 %v758_v38, %v261_v11 }
  0xf2   :  { %v342_v14 = vadd.f32 %v758_v38, %v341_v12  ;;  %389 = vst [vmem:[#allocation2 + $0x48] sm:$0xff] %v267_v9 }
  0xf3   :  { %405 = vst [vmem:[#allocation2 + $0xc8] sm:$0xff] %v347_v10  ;;  %388 = vst [vmem:[#allocation2 + $0x40] sm:$0xff] %v262_v13  ;;  %v522_v15 = vpop.f32.mrb[10].mxu0 }
  0xf4   :  { %404 = vst [vmem:[#allocation2 + $0xc0] sm:$0xff] %v342_v14  ;;  %v546_v16 = vpop.f32.mrb[10].mxu1  ;;  %v277_v17 = vadd.f32 %v522_v15, %v758_v38  ;;  %v271_v19 = vpop.f32.mrb[11].mxu0 }
  0xf5   :  { %v357_v18 = vadd.f32 %v546_v16, %v758_v38  ;;  %v351_v20 = vpop.f32.mrb[11].mxu1  ;;  %v272_v21 = vadd.f32 %v758_v38, %v271_v19 }
  0xf6   :  { %v352_v22 = vadd.f32 %v758_v38, %v351_v20  ;;  %391 = vst [vmem:[#allocation2 + $0x58] sm:$0xff] %v277_v17 }
  0xf7   :  { %407 = vst [vmem:[#allocation2 + $0xd8] sm:$0xff] %v357_v18  ;;  %390 = vst [vmem:[#allocation2 + $0x50] sm:$0xff] %v272_v21  ;;  %v525_v23 = vpop.f32.mrb[12].mxu0 }
  0xf8   :  { %406 = vst [vmem:[#allocation2 + $0xd0] sm:$0xff] %v352_v22  ;;  %v549_v24 = vpop.f32.mrb[12].mxu1  ;;  %v287_v25 = vadd.f32 %v525_v23, %v758_v38  ;;  %v281_v27 = vpop.f32.mrb[13].mxu0 }
  0xf9   :  { %v367_v26 = vadd.f32 %v549_v24, %v758_v38  ;;  %v361_v28 = vpop.f32.mrb[13].mxu1  ;;  %v282_v29 = vadd.f32 %v758_v38, %v281_v27 }
  0xfa   :  { %v362_v30 = vadd.f32 %v758_v38, %v361_v28  ;;  %393 = vst [vmem:[#allocation2 + $0x68] sm:$0xff] %v287_v25 }
  0xfb   :  { %409 = vst [vmem:[#allocation2 + $0xe8] sm:$0xff] %v367_v26  ;;  %392 = vst [vmem:[#allocation2 + $0x60] sm:$0xff] %v282_v29  ;;  %v528_v31 = vpop.f32.mrb[14].mxu0 }
  0xfc   :  { %408 = vst [vmem:[#allocation2 + $0xe0] sm:$0xff] %v362_v30  ;;  %v552_v32 = vpop.f32.mrb[14].mxu1  ;;  %v297_v33 = vadd.f32 %v528_v31, %v758_v38  ;;  %v291_v35 = vpop.f32.mrb[15].mxu0 }
  0xfd   :  { %v377_v34 = vadd.f32 %v552_v32, %v758_v38  ;;  %v371_v36 = vpop.f32.mrb[15].mxu1  ;;  %v292_v37 = vadd.f32 %v758_v38, %v291_v35 }
  0xfe   :  { %v372_v39 = vadd.f32 %v758_v38, %v371_v36  ;;  %395 = vst [vmem:[#allocation2 + $0x78] sm:$0xff] %v297_v33 }
  0xff   :  { %411 = vst [vmem:[#allocation2 + $0xf8] sm:$0xff] %v377_v34  ;;  %394 = vst [vmem:[#allocation2 + $0x70] sm:$0xff] %v292_v37 }
 0x100   :  { %410 = vst [vmem:[#allocation2 + $0xf0] sm:$0xff] %v372_v39 }
 0x101   :  { %579 = shalt.err (!%p576_p4)
}
 0x102   :  { %s580_s5 = scalar_lea.hbm %s807_s3, 4096 }
 0x103   :  { %p581_p5 = scmp.ne.s32.totalorder %s807_s3, %s580_s5  ;;  %p584_p6 = scmp.lt.u32.totalorder %s580_s5, %s807_s3 }
 0x105   :  { %p586_p7 = pnand %p584_p6, %p581_p5 }
 0x107   :  { %589 = shalt.err (!%p586_p7)
}
 0x108   :  { %s593_s10 = smov 128   ;;  %s594_s11 = smov 8  }
 0x109   :  { %423 = dma.vmem_to_hbm [thread:$0]  %s418_s2, 4096, %s807_s3, [#allocation3], %s593_s10, %s593_s10, %s594_s11  }
 0x10a   :  { %590 = dma.done.wait [#allocation3], 4096  }
 0x10b   :  { %591 = vsyncadd [#allocation3], 4294963200 }
 0x10c   :  { %427 = vsyncpa [#allocation3], 1 }

</bundles_post_ra>
